<compile_context>
chip_gen: v5e
topology: v5e:2x2
jax: 0.10.0
libtpu: 0.0.40
codegen_flags: <defaults>
</compile_context>

<pallas_src>
import functools

import jax
import jax.numpy as jnp
from jax.experimental import pallas as pl
from jax.experimental.pallas import tpu as pltpu

MIN_STDDEV = 0.1


def _softplus(x):
    # numerically-stable softplus using EUP-friendly ops
    return jnp.maximum(x, 0.0) + jnp.log1p(jnp.exp(-jnp.abs(x)))


def _sigmoid(x):
    # logistic via EUP tanh (avoids a full-precision VALU divide)
    return 0.5 * (jnp.tanh(0.5 * x) + 1.0)


# ----------------------------------------------------------------------------
# Kernel
# ----------------------------------------------------------------------------
def _rssm_kernel(S, D, E, PAD,
                 # activations
                 prev_sample_ref, prev_det_ref, context_ref, obs_ref,
                 noise_p_ref, noise_q_ref,
                 # prior MLP weights
                 wp1s_ref, wp1c_ref, wp2_ref, wpms_ref,
                 # obs embed
                 woe_ref,
                 # posterior MLP weights
                 wq1d_ref, wq1e_ref, wq2_ref, wqms_ref,
                 # shared GRUCell weights (fused gates, PyTorch r,z,n order)
                 wih_ref, whh_ref,
                 # packed bias slab
                 bias_ref,
                 # single lane-dense output slab
                 out_ref):
    f32 = jnp.float32
    bf16 = jnp.bfloat16

    def dot(a, w_ref):
        # bf16 weights on the MXU, f32 accumulation
        return jnp.dot(a.astype(bf16), w_ref[...], preferred_element_type=f32)

    def bias(i, w):
        # one row of the packed bias slab (f32), first w lanes
        return bias_ref[i:i + 1, :w]

    b_ih = bias(7, 3 * D)
    b_hh = bias(8, 3 * D)

    def gru(x, h):
        # PyTorch GRUCell:
        #   r = sigmoid(Wir x + bir + Whr h + bhr)
        #   z = sigmoid(Wiz x + biz + Whz h + bhz)
        #   n = tanh  (Win x + bin + r * (Whn h + bhn))
        #   h' = (1 - z) * n + z * h
        gi = dot(x, wih_ref) + b_ih          # (B, 3D)
        gh = dot(h, whh_ref) + b_hh          # (B, 3D)
        r = _sigmoid(gi[:, 0:D] + gh[:, 0:D])
        z = _sigmoid(gi[:, D:2 * D] + gh[:, D:2 * D])
        n = jnp.tanh(gi[:, 2 * D:3 * D] + r * gh[:, 2 * D:3 * D])
        return (1.0 - z) * n + z * h

    prev_sample = prev_sample_ref[...]
    prev_det = prev_det_ref[...]
    context = context_ref[...]

    # -------- prior --------
    # cat([sample, context]) @ W1  ==  sample @ W1_s + context @ W1_c
    h = jnp.maximum(dot(prev_sample, wp1s_ref) + dot(context, wp1c_ref)
                    + bias(0, E), 0.0)
    h = jnp.maximum(dot(h, wp2_ref) + bias(1, E), 0.0)
    pms = dot(h, wpms_ref) + bias(2, 2 * S)            # [mean | std_pre]
    p_mean = pms[:, 0:S]
    p_std = _softplus(pms[:, S:2 * S] + 0.54) + MIN_STDDEV
    p_sample = p_mean + p_std * noise_p_ref[...]
    p_det = gru(h, prev_det)

    # -------- posterior --------
    emb = jnp.maximum(dot(obs_ref[...], woe_ref) + bias(3, E), 0.0)
    h = jnp.maximum(dot(p_det, wq1d_ref) + dot(emb, wq1e_ref) + bias(4, E), 0.0)
    h = jnp.maximum(dot(h, wq2_ref) + bias(5, E), 0.0)
    qms = dot(h, wqms_ref) + bias(6, 2 * S)
    q_mean = qms[:, 0:S]
    q_std = _softplus(qms[:, S:2 * S] + 0.54) + MIN_STDDEV
    q_sample = q_mean + q_std * noise_q_ref[...]
    q_det = gru(h, p_det)

    # -------- one lane-dense output slab --------
    # layout per branch: [mean | stddev | sample | det]  -> 'output' is the
    # contiguous [sample | det] slice, no host-side concat needed.
    pieces = [p_mean, p_std, p_sample, p_det,
              q_mean, q_std, q_sample, q_det]
    if PAD > 0:
        pieces.append(jnp.zeros((p_mean.shape[0], PAD), f32))
    out_ref[...] = jnp.concatenate(pieces, axis=-1)


# ----------------------------------------------------------------------------
# Parameter construction (deterministic, in-script)
# ----------------------------------------------------------------------------
_WEIGHT_ORDER = ["wp1s", "wp1c", "wp2", "wpms", "woe",
                 "wq1d", "wq1e", "wq2", "wqms", "wih", "whh"]
_BIAS_ORDER = ["bp1", "bp2", "bpms", "boe", "bq1", "bq2", "bqms", "bih", "bhh"]


def _kaiming_uniform(key, fan_in, fan_out):
    # kaiming-uniform (relu): U(-sqrt(6/fan_in), sqrt(6/fan_in))
    limit = jnp.sqrt(6.0 / fan_in)
    return jax.random.uniform(key, (fan_in, fan_out), jnp.float32, -limit, limit)


def pack_biases(p):
    """Pack all biases into one (num_biases, max_width) f32 slab (one DMA)."""
    maxw = max(p[k].shape[-1] for k in _BIAS_ORDER)
    rows = [jnp.pad(p[k].reshape(-1), (0, maxw - p[k].shape[-1]))
            for k in _BIAS_ORDER]
    return jnp.stack(rows, axis=0)


def make_params(key, stoch, deter, embed, obs_embed, nonzero_bias=True):
    bf16 = jnp.bfloat16
    ks = jax.random.split(key, 20)
    p = {}

    def mk_b(k, n):
        # init_weights uses zero biases; random small biases here exercise the
        # packed-bias path in the numeric check (forward semantics are generic).
        if nonzero_bias:
            return jax.random.uniform(k, (1, n), jnp.float32, -0.05, 0.05)
        return jnp.zeros((1, n), jnp.float32)

    # prior h1 (split by input for cat([sample, context]))
    w = _kaiming_uniform(ks[0], stoch + deter, embed)
    p["wp1s"], p["wp1c"] = w[:stoch].astype(bf16), w[stoch:].astype(bf16)
    p["bp1"] = mk_b(ks[1], embed)
    p["wp2"] = _kaiming_uniform(ks[2], embed, embed).astype(bf16)
    p["bp2"] = mk_b(ks[3], embed)
    # fused prior mean|stddev head
    wm = _kaiming_uniform(ks[4], embed, stoch)
    ws = _kaiming_uniform(ks[5], embed, stoch)
    p["wpms"] = jnp.concatenate([wm, ws], axis=1).astype(bf16)
    p["bpms"] = mk_b(ks[6], 2 * stoch)
    # obs embed
    p["woe"] = _kaiming_uniform(ks[7], obs_embed, embed).astype(bf16)
    p["boe"] = mk_b(ks[8], embed)
    # posterior h1 (split by input for cat([det, emb]))
    w = _kaiming_uniform(ks[9], deter + embed, embed)
    p["wq1d"], p["wq1e"] = w[:deter].astype(bf16), w[deter:].astype(bf16)
    p["bq1"] = mk_b(ks[10], embed)
    p["wq2"] = _kaiming_uniform(ks[11], embed, embed).astype(bf16)
    p["bq2"] = mk_b(ks[12], embed)
    # fused posterior mean|stddev head
    wm = _kaiming_uniform(ks[13], embed, stoch)
    ws = _kaiming_uniform(ks[14], embed, stoch)
    p["wqms"] = jnp.concatenate([wm, ws], axis=1).astype(bf16)
    p["bqms"] = mk_b(ks[15], 2 * stoch)
    # shared GRUCell: fused gate weights, PyTorch (r, z, n) order, stored (in, 3H)
    p["wih"] = _kaiming_uniform(ks[16], embed, 3 * deter).astype(bf16)
    p["whh"] = _kaiming_uniform(ks[17], deter, 3 * deter).astype(bf16)
    p["bih"] = mk_b(ks[18], 3 * deter)
    p["bhh"] = mk_b(ks[19], 3 * deter)

    p["bias_slab"] = pack_biases(p)
    return p


# ----------------------------------------------------------------------------
# Wrapper
# ----------------------------------------------------------------------------
def rssm_cell(params, prev_out, inputs, noise_p, noise_q, use_observation=True):
    """Forward pass of RSSMCell.

    prev_out: {'state': {'sample': (B,S), 'det_state': (B,D)}}
    inputs:   (obs (B,obs_embed), context (B,D))
    """
    prev_state = prev_out["state"]
    obs, context = inputs
    prev_sample = prev_state["sample"]
    prev_det = prev_state["det_state"]

    B, S = prev_sample.shape
    D = prev_det.shape[1]
    E = params["wp2"].shape[0]

    half = 3 * S + D                       # [mean | std | sample | det]
    total = 2 * half
    padded = pl.cdiv(total, 128) * 128     # lane-dense output width
    pad = padded - total

    kernel = functools.partial(_rssm_kernel, S, D, E, pad)

    vmem = pl.BlockSpec(memory_space=pltpu.MemorySpace.VMEM)
    args = ([prev_sample, prev_det, context, obs, noise_p, noise_q]
            + [params[k] for k in _WEIGHT_ORDER]
            + [params["bias_slab"]])

    slab = pl.pallas_call(
        kernel,
        out_shape=jax.ShapeDtypeStruct((B, padded), jnp.float32),
        in_specs=[vmem] * len(args),
        out_specs=vmem,
    )(*args)

    def unpack(base):
        det = slab[:, base + 3 * S: base + half]
        return {
            "mean": slab[:, base: base + S],
            "stddev": slab[:, base + S: base + 2 * S],
            "sample": slab[:, base + 2 * S: base + 3 * S],
            "det_out": det,
            "det_state": det,
            # contiguous [sample | det] slice straight from the kernel slab
            "output": slab[:, base + 2 * S: base + half],
        }

    prior = unpack(0)
    posterior = unpack(half) if use_observation else prior
    return {"out": [prior, posterior], "state": posterior}


# ----------------------------------------------------------------------------
# Pure-JAX reference (same numerics: bf16 weights, f32 accumulation)
# ----------------------------------------------------------------------------
def _ref_forward(p, prev_sample, prev_det, context, obs, noise_p, noise_q):
    S = prev_sample.shape[1]
    D = prev_det.shape[1]

    def d(a, w):
        return jnp.dot(a.astype(jnp.bfloat16), w,
                       preferred_element_type=jnp.float32)

    def gru(x, h):
        gi = d(x, p["wih"]) + p["bih"]
        gh = d(h, p["whh"]) + p["bhh"]
        r = _sigmoid(gi[:, :D] + gh[:, :D])
        z = _sigmoid(gi[:, D:2 * D] + gh[:, D:2 * D])
        n = jnp.tanh(gi[:, 2 * D:] + r * gh[:, 2 * D:])
        return (1 - z) * n + z * h

    h = jax.nn.relu(d(prev_sample, p["wp1s"]) + d(context, p["wp1c"]) + p["bp1"])
    h = jax.nn.relu(d(h, p["wp2"]) + p["bp2"])
    pms = d(h, p["wpms"]) + p["bpms"]
    p_mean = pms[:, :S]
    p_std = _softplus(pms[:, S:] + 0.54) + MIN_STDDEV
    p_sample = p_mean + p_std * noise_p
    p_det = gru(h, prev_det)

    emb = jax.nn.relu(d(obs, p["woe"]) + p["boe"])
    h = jax.nn.relu(d(p_det, p["wq1d"]) + d(emb, p["wq1e"]) + p["bq1"])
    h = jax.nn.relu(d(h, p["wq2"]) + p["bq2"])
    qms = d(h, p["wqms"]) + p["bqms"]
    q_mean = qms[:, :S]
    q_std = _softplus(qms[:, S:] + 0.54) + MIN_STDDEV
    q_sample = q_mean + q_std * noise_q
    q_det = gru(h, p_det)
    return p_mean, p_std, p_sample, p_det, q_mean, q_std, q_sample, q_det


if __name__ == "__main__":
    # small, module-consistent sizes
    B, STOCH, DETER, EMBED, OBS_EMBED = 8, 32, 64, 64, 48

    key = jax.random.PRNGKey(0)
    k_par, k_obs, k_ctx, k_smp, k_det, k_np, k_nq = jax.random.split(key, 7)

    params = make_params(k_par, STOCH, DETER, EMBED, OBS_EMBED)

    obs = jax.random.normal(k_obs, (B, OBS_EMBED), jnp.float32)
    context = jax.random.normal(k_ctx, (B, DETER), jnp.float32)
    prev_sample = jax.random.normal(k_smp, (B, STOCH), jnp.float32)
    prev_det = jax.random.normal(k_det, (B, DETER), jnp.float32)
    noise_p = jax.random.normal(k_np, (B, STOCH), jnp.float32)
    noise_q = jax.random.normal(k_nq, (B, STOCH), jnp.float32)

    prev_out = {"state": {"sample": prev_sample, "det_state": prev_det}}

    result = rssm_cell(params, prev_out, (obs, context), noise_p, noise_q,
                       use_observation=True)
    jax.block_until_ready(result)

    # sanity check against the pure-JAX reference
    ref = _ref_forward(params, prev_sample, prev_det, context, obs,
                       noise_p, noise_q)
    prior, post = result["out"]
    got = (prior["mean"], prior["stddev"], prior["sample"], prior["det_state"],
           post["mean"], post["stddev"], post["sample"], post["det_state"])
    for g, r in zip(got, ref):
        assert jnp.allclose(g, r, atol=1e-3, rtol=1e-3), "kernel/ref mismatch"
    assert jnp.allclose(prior["output"],
                        jnp.concatenate([ref[2], ref[3]], axis=-1),
                        atol=1e-3, rtol=1e-3), "output slice mismatch"

    print("KERNEL_OK")
</pallas_src>

<mosaic_0001>
module attributes {stable_mosaic.version = 11 : i64} {
  func.func @_rssm_kernel(%arg0: memref<8x32xf32, #tpu.memory_space<vmem>>, %arg1: memref<8x64xf32, #tpu.memory_space<vmem>>, %arg2: memref<8x64xf32, #tpu.memory_space<vmem>>, %arg3: memref<8x48xf32, #tpu.memory_space<vmem>>, %arg4: memref<8x32xf32, #tpu.memory_space<vmem>>, %arg5: memref<8x32xf32, #tpu.memory_space<vmem>>, %arg6: memref<32x64xbf16, #tpu.memory_space<vmem>>, %arg7: memref<64x64xbf16, #tpu.memory_space<vmem>>, %arg8: memref<64x64xbf16, #tpu.memory_space<vmem>>, %arg9: memref<64x64xbf16, #tpu.memory_space<vmem>>, %arg10: memref<48x64xbf16, #tpu.memory_space<vmem>>, %arg11: memref<64x64xbf16, #tpu.memory_space<vmem>>, %arg12: memref<64x64xbf16, #tpu.memory_space<vmem>>, %arg13: memref<64x64xbf16, #tpu.memory_space<vmem>>, %arg14: memref<64x64xbf16, #tpu.memory_space<vmem>>, %arg15: memref<64x192xbf16, #tpu.memory_space<vmem>>, %arg16: memref<64x192xbf16, #tpu.memory_space<vmem>>, %arg17: memref<9x192xf32, #tpu.memory_space<vmem>>, %arg18: memref<8x384xf32, #tpu.memory_space<vmem>>) attributes {dimension_semantics = [], scalar_prefetch = 0 : i64, scratch_operands = 0 : i64, tpu.core_type = #tpu.core_type<tc>} {
    %c7 = arith.constant 7 : index
    %c0 = arith.constant 0 : index
    %0 = vector.load %arg17[%c7, %c0] : memref<9x192xf32, #tpu.memory_space<vmem>>, vector<1x192xf32>
    %c8 = arith.constant 8 : index
    %c0_0 = arith.constant 0 : index
    %1 = vector.load %arg17[%c8, %c0_0] : memref<9x192xf32, #tpu.memory_space<vmem>>, vector<1x192xf32>
    %c0_1 = arith.constant 0 : index
    %c0_2 = arith.constant 0 : index
    %2 = vector.load %arg0[%c0_1, %c0_2] : memref<8x32xf32, #tpu.memory_space<vmem>>, vector<8x32xf32>
    %c0_3 = arith.constant 0 : index
    %c0_4 = arith.constant 0 : index
    %3 = vector.load %arg1[%c0_3, %c0_4] : memref<8x64xf32, #tpu.memory_space<vmem>>, vector<8x64xf32>
    %c0_5 = arith.constant 0 : index
    %c0_6 = arith.constant 0 : index
    %4 = vector.load %arg2[%c0_5, %c0_6] : memref<8x64xf32, #tpu.memory_space<vmem>>, vector<8x64xf32>
    %5 = arith.truncf %2 : vector<8x32xf32> to vector<8x32xbf16>
    %c0_7 = arith.constant 0 : index
    %c0_8 = arith.constant 0 : index
    %6 = vector.load %arg6[%c0_7, %c0_8] : memref<32x64xbf16, #tpu.memory_space<vmem>>, vector<32x64xbf16>
    %cst = arith.constant dense<0.000000e+00> : vector<8x64xf32>
    %7 = tpu.matmul %5, %6, %cst {dimension_numbers = #tpu.dot_dimension_numbers<[1], [0], [0], [1], [0, 0, 1, 1], [], []>} : vector<8x32xbf16>, vector<32x64xbf16>, vector<8x64xf32> -> vector<8x64xf32>
    %8 = arith.truncf %4 : vector<8x64xf32> to vector<8x64xbf16>
    %c0_9 = arith.constant 0 : index
    %c0_10 = arith.constant 0 : index
    %9 = vector.load %arg7[%c0_9, %c0_10] : memref<64x64xbf16, #tpu.memory_space<vmem>>, vector<64x64xbf16>
    %cst_11 = arith.constant dense<0.000000e+00> : vector<8x64xf32>
    %10 = tpu.matmul %8, %9, %cst_11 {dimension_numbers = #tpu.dot_dimension_numbers<[1], [0], [0], [1], [0, 0, 1, 1], [], []>} : vector<8x64xbf16>, vector<64x64xbf16>, vector<8x64xf32> -> vector<8x64xf32>
    %11 = arith.addf %7, %10 : vector<8x64xf32>
    %c0_12 = arith.constant 0 : index
    %c0_13 = arith.constant 0 : index
    %12 = vector.load %arg17[%c0_12, %c0_13] : memref<9x192xf32, #tpu.memory_space<vmem>>, vector<1x64xf32>
    %13 = vector.broadcast %12 : vector<1x64xf32> to vector<8x64xf32>
    %14 = arith.addf %11, %13 : vector<8x64xf32>
    %cst_14 = arith.constant 0.000000e+00 : f32
    %15 = vector.broadcast %cst_14 : f32 to vector<8x64xf32>
    %16 = arith.maximumf %14, %15 : vector<8x64xf32>
    %17 = arith.truncf %16 : vector<8x64xf32> to vector<8x64xbf16>
    %c0_15 = arith.constant 0 : index
    %c0_16 = arith.constant 0 : index
    %18 = vector.load %arg8[%c0_15, %c0_16] : memref<64x64xbf16, #tpu.memory_space<vmem>>, vector<64x64xbf16>
    %cst_17 = arith.constant dense<0.000000e+00> : vector<8x64xf32>
    %19 = tpu.matmul %17, %18, %cst_17 {dimension_numbers = #tpu.dot_dimension_numbers<[1], [0], [0], [1], [0, 0, 1, 1], [], []>} : vector<8x64xbf16>, vector<64x64xbf16>, vector<8x64xf32> -> vector<8x64xf32>
    %c1 = arith.constant 1 : index
    %c0_18 = arith.constant 0 : index
    %20 = vector.load %arg17[%c1, %c0_18] : memref<9x192xf32, #tpu.memory_space<vmem>>, vector<1x64xf32>
    %21 = vector.broadcast %20 : vector<1x64xf32> to vector<8x64xf32>
    %22 = arith.addf %19, %21 : vector<8x64xf32>
    %cst_19 = arith.constant 0.000000e+00 : f32
    %23 = vector.broadcast %cst_19 : f32 to vector<8x64xf32>
    %24 = arith.maximumf %22, %23 : vector<8x64xf32>
    %25 = arith.truncf %24 : vector<8x64xf32> to vector<8x64xbf16>
    %c0_20 = arith.constant 0 : index
    %c0_21 = arith.constant 0 : index
    %26 = vector.load %arg9[%c0_20, %c0_21] : memref<64x64xbf16, #tpu.memory_space<vmem>>, vector<64x64xbf16>
    %cst_22 = arith.constant dense<0.000000e+00> : vector<8x64xf32>
    %27 = tpu.matmul %25, %26, %cst_22 {dimension_numbers = #tpu.dot_dimension_numbers<[1], [0], [0], [1], [0, 0, 1, 1], [], []>} : vector<8x64xbf16>, vector<64x64xbf16>, vector<8x64xf32> -> vector<8x64xf32>
    %c2 = arith.constant 2 : index
    %c0_23 = arith.constant 0 : index
    %28 = vector.load %arg17[%c2, %c0_23] : memref<9x192xf32, #tpu.memory_space<vmem>>, vector<1x64xf32>
    %29 = vector.broadcast %28 : vector<1x64xf32> to vector<8x64xf32>
    %30 = arith.addf %27, %29 : vector<8x64xf32>
    %31 = vector.extract_strided_slice %30 {offsets = [0, 0], sizes = [8, 32], strides = [1, 1]} : vector<8x64xf32> to vector<8x32xf32>
    %32 = vector.extract_strided_slice %30 {offsets = [0, 32], sizes = [8, 32], strides = [1, 1]} : vector<8x64xf32> to vector<8x32xf32>
    %cst_24 = arith.constant 5.400000e-01 : f32
    %33 = vector.broadcast %cst_24 : f32 to vector<8x32xf32>
    %34 = arith.addf %32, %33 : vector<8x32xf32>
    %cst_25 = arith.constant 0.000000e+00 : f32
    %35 = vector.broadcast %cst_25 : f32 to vector<8x32xf32>
    %36 = arith.maximumf %34, %35 : vector<8x32xf32>
    %37 = math.absf %34 : vector<8x32xf32>
    %cst_26 = arith.constant 0.000000e+00 : f32
    %38 = vector.broadcast %cst_26 : f32 to vector<8x32xf32>
    %39 = arith.subf %38, %37 : vector<8x32xf32>
    %40 = math.exp %39 : vector<8x32xf32>
    %41 = math.log1p %40 : vector<8x32xf32>
    %42 = arith.addf %36, %41 : vector<8x32xf32>
    %cst_27 = arith.constant 1.000000e-01 : f32
    %43 = vector.broadcast %cst_27 : f32 to vector<8x32xf32>
    %44 = arith.addf %42, %43 : vector<8x32xf32>
    %c0_28 = arith.constant 0 : index
    %c0_29 = arith.constant 0 : index
    %45 = vector.load %arg4[%c0_28, %c0_29] : memref<8x32xf32, #tpu.memory_space<vmem>>, vector<8x32xf32>
    %46 = arith.mulf %44, %45 : vector<8x32xf32>
    %47 = arith.addf %31, %46 : vector<8x32xf32>
    %48 = arith.truncf %24 : vector<8x64xf32> to vector<8x64xbf16>
    %c0_30 = arith.constant 0 : index
    %c0_31 = arith.constant 0 : index
    %49 = vector.load %arg15[%c0_30, %c0_31] : memref<64x192xbf16, #tpu.memory_space<vmem>>, vector<64x192xbf16>
    %cst_32 = arith.constant dense<0.000000e+00> : vector<8x192xf32>
    %50 = tpu.matmul %48, %49, %cst_32 {dimension_numbers = #tpu.dot_dimension_numbers<[1], [0], [0], [1], [0, 0, 1, 1], [], []>} : vector<8x64xbf16>, vector<64x192xbf16>, vector<8x192xf32> -> vector<8x192xf32>
    %51 = vector.broadcast %0 : vector<1x192xf32> to vector<8x192xf32>
    %52 = arith.addf %50, %51 : vector<8x192xf32>
    %53 = arith.truncf %3 : vector<8x64xf32> to vector<8x64xbf16>
    %c0_33 = arith.constant 0 : index
    %c0_34 = arith.constant 0 : index
    %54 = vector.load %arg16[%c0_33, %c0_34] : memref<64x192xbf16, #tpu.memory_space<vmem>>, vector<64x192xbf16>
    %cst_35 = arith.constant dense<0.000000e+00> : vector<8x192xf32>
    %55 = tpu.matmul %53, %54, %cst_35 {dimension_numbers = #tpu.dot_dimension_numbers<[1], [0], [0], [1], [0, 0, 1, 1], [], []>} : vector<8x64xbf16>, vector<64x192xbf16>, vector<8x192xf32> -> vector<8x192xf32>
    %56 = vector.broadcast %1 : vector<1x192xf32> to vector<8x192xf32>
    %57 = arith.addf %55, %56 : vector<8x192xf32>
    %58 = vector.extract_strided_slice %52 {offsets = [0, 0], sizes = [8, 64], strides = [1, 1]} : vector<8x192xf32> to vector<8x64xf32>
    %59 = vector.extract_strided_slice %57 {offsets = [0, 0], sizes = [8, 64], strides = [1, 1]} : vector<8x192xf32> to vector<8x64xf32>
    %60 = arith.addf %58, %59 : vector<8x64xf32>
    %cst_36 = arith.constant 5.000000e-01 : f32
    %61 = vector.broadcast %cst_36 : f32 to vector<8x64xf32>
    %62 = arith.mulf %61, %60 : vector<8x64xf32>
    %63 = math.tanh %62 : vector<8x64xf32>
    %cst_37 = arith.constant 1.000000e+00 : f32
    %64 = vector.broadcast %cst_37 : f32 to vector<8x64xf32>
    %65 = arith.addf %63, %64 : vector<8x64xf32>
    %cst_38 = arith.constant 5.000000e-01 : f32
    %66 = vector.broadcast %cst_38 : f32 to vector<8x64xf32>
    %67 = arith.mulf %66, %65 : vector<8x64xf32>
    %68 = vector.extract_strided_slice %52 {offsets = [0, 64], sizes = [8, 64], strides = [1, 1]} : vector<8x192xf32> to vector<8x64xf32>
    %69 = vector.extract_strided_slice %57 {offsets = [0, 64], sizes = [8, 64], strides = [1, 1]} : vector<8x192xf32> to vector<8x64xf32>
    %70 = arith.addf %68, %69 : vector<8x64xf32>
    %cst_39 = arith.constant 5.000000e-01 : f32
    %71 = vector.broadcast %cst_39 : f32 to vector<8x64xf32>
    %72 = arith.mulf %71, %70 : vector<8x64xf32>
    %73 = math.tanh %72 : vector<8x64xf32>
    %cst_40 = arith.constant 1.000000e+00 : f32
    %74 = vector.broadcast %cst_40 : f32 to vector<8x64xf32>
    %75 = arith.addf %73, %74 : vector<8x64xf32>
    %cst_41 = arith.constant 5.000000e-01 : f32
    %76 = vector.broadcast %cst_41 : f32 to vector<8x64xf32>
    %77 = arith.mulf %76, %75 : vector<8x64xf32>
    %78 = vector.extract_strided_slice %52 {offsets = [0, 128], sizes = [8, 64], strides = [1, 1]} : vector<8x192xf32> to vector<8x64xf32>
    %79 = vector.extract_strided_slice %57 {offsets = [0, 128], sizes = [8, 64], strides = [1, 1]} : vector<8x192xf32> to vector<8x64xf32>
    %80 = arith.mulf %67, %79 : vector<8x64xf32>
    %81 = arith.addf %78, %80 : vector<8x64xf32>
    %82 = math.tanh %81 : vector<8x64xf32>
    %cst_42 = arith.constant 1.000000e+00 : f32
    %83 = vector.broadcast %cst_42 : f32 to vector<8x64xf32>
    %84 = arith.subf %83, %77 : vector<8x64xf32>
    %85 = arith.mulf %84, %82 : vector<8x64xf32>
    %86 = arith.mulf %77, %3 : vector<8x64xf32>
    %87 = arith.addf %85, %86 : vector<8x64xf32>
    %c0_43 = arith.constant 0 : index
    %c0_44 = arith.constant 0 : index
    %88 = vector.load %arg3[%c0_43, %c0_44] : memref<8x48xf32, #tpu.memory_space<vmem>>, vector<8x48xf32>
    %89 = arith.truncf %88 : vector<8x48xf32> to vector<8x48xbf16>
    %c0_45 = arith.constant 0 : index
    %c0_46 = arith.constant 0 : index
    %90 = vector.load %arg10[%c0_45, %c0_46] : memref<48x64xbf16, #tpu.memory_space<vmem>>, vector<48x64xbf16>
    %cst_47 = arith.constant dense<0.000000e+00> : vector<8x64xf32>
    %91 = tpu.matmul %89, %90, %cst_47 {dimension_numbers = #tpu.dot_dimension_numbers<[1], [0], [0], [1], [0, 0, 1, 1], [], []>} : vector<8x48xbf16>, vector<48x64xbf16>, vector<8x64xf32> -> vector<8x64xf32>
    %c3 = arith.constant 3 : index
    %c0_48 = arith.constant 0 : index
    %92 = vector.load %arg17[%c3, %c0_48] : memref<9x192xf32, #tpu.memory_space<vmem>>, vector<1x64xf32>
    %93 = vector.broadcast %92 : vector<1x64xf32> to vector<8x64xf32>
    %94 = arith.addf %91, %93 : vector<8x64xf32>
    %cst_49 = arith.constant 0.000000e+00 : f32
    %95 = vector.broadcast %cst_49 : f32 to vector<8x64xf32>
    %96 = arith.maximumf %94, %95 : vector<8x64xf32>
    %97 = arith.truncf %87 : vector<8x64xf32> to vector<8x64xbf16>
    %c0_50 = arith.constant 0 : index
    %c0_51 = arith.constant 0 : index
    %98 = vector.load %arg11[%c0_50, %c0_51] : memref<64x64xbf16, #tpu.memory_space<vmem>>, vector<64x64xbf16>
    %cst_52 = arith.constant dense<0.000000e+00> : vector<8x64xf32>
    %99 = tpu.matmul %97, %98, %cst_52 {dimension_numbers = #tpu.dot_dimension_numbers<[1], [0], [0], [1], [0, 0, 1, 1], [], []>} : vector<8x64xbf16>, vector<64x64xbf16>, vector<8x64xf32> -> vector<8x64xf32>
    %100 = arith.truncf %96 : vector<8x64xf32> to vector<8x64xbf16>
    %c0_53 = arith.constant 0 : index
    %c0_54 = arith.constant 0 : index
    %101 = vector.load %arg12[%c0_53, %c0_54] : memref<64x64xbf16, #tpu.memory_space<vmem>>, vector<64x64xbf16>
    %cst_55 = arith.constant dense<0.000000e+00> : vector<8x64xf32>
    %102 = tpu.matmul %100, %101, %cst_55 {dimension_numbers = #tpu.dot_dimension_numbers<[1], [0], [0], [1], [0, 0, 1, 1], [], []>} : vector<8x64xbf16>, vector<64x64xbf16>, vector<8x64xf32> -> vector<8x64xf32>
    %103 = arith.addf %99, %102 : vector<8x64xf32>
    %c4 = arith.constant 4 : index
    %c0_56 = arith.constant 0 : index
    %104 = vector.load %arg17[%c4, %c0_56] : memref<9x192xf32, #tpu.memory_space<vmem>>, vector<1x64xf32>
    %105 = vector.broadcast %104 : vector<1x64xf32> to vector<8x64xf32>
    %106 = arith.addf %103, %105 : vector<8x64xf32>
    %cst_57 = arith.constant 0.000000e+00 : f32
    %107 = vector.broadcast %cst_57 : f32 to vector<8x64xf32>
    %108 = arith.maximumf %106, %107 : vector<8x64xf32>
    %109 = arith.truncf %108 : vector<8x64xf32> to vector<8x64xbf16>
    %c0_58 = arith.constant 0 : index
    %c0_59 = arith.constant 0 : index
    %110 = vector.load %arg13[%c0_58, %c0_59] : memref<64x64xbf16, #tpu.memory_space<vmem>>, vector<64x64xbf16>
    %cst_60 = arith.constant dense<0.000000e+00> : vector<8x64xf32>
    %111 = tpu.matmul %109, %110, %cst_60 {dimension_numbers = #tpu.dot_dimension_numbers<[1], [0], [0], [1], [0, 0, 1, 1], [], []>} : vector<8x64xbf16>, vector<64x64xbf16>, vector<8x64xf32> -> vector<8x64xf32>
    %c5 = arith.constant 5 : index
    %c0_61 = arith.constant 0 : index
    %112 = vector.load %arg17[%c5, %c0_61] : memref<9x192xf32, #tpu.memory_space<vmem>>, vector<1x64xf32>
    %113 = vector.broadcast %112 : vector<1x64xf32> to vector<8x64xf32>
    %114 = arith.addf %111, %113 : vector<8x64xf32>
    %cst_62 = arith.constant 0.000000e+00 : f32
    %115 = vector.broadcast %cst_62 : f32 to vector<8x64xf32>
    %116 = arith.maximumf %114, %115 : vector<8x64xf32>
    %117 = arith.truncf %116 : vector<8x64xf32> to vector<8x64xbf16>
    %c0_63 = arith.constant 0 : index
    %c0_64 = arith.constant 0 : index
    %118 = vector.load %arg14[%c0_63, %c0_64] : memref<64x64xbf16, #tpu.memory_space<vmem>>, vector<64x64xbf16>
    %cst_65 = arith.constant dense<0.000000e+00> : vector<8x64xf32>
    %119 = tpu.matmul %117, %118, %cst_65 {dimension_numbers = #tpu.dot_dimension_numbers<[1], [0], [0], [1], [0, 0, 1, 1], [], []>} : vector<8x64xbf16>, vector<64x64xbf16>, vector<8x64xf32> -> vector<8x64xf32>
    %c6 = arith.constant 6 : index
    %c0_66 = arith.constant 0 : index
    %120 = vector.load %arg17[%c6, %c0_66] : memref<9x192xf32, #tpu.memory_space<vmem>>, vector<1x64xf32>
    %121 = vector.broadcast %120 : vector<1x64xf32> to vector<8x64xf32>
    %122 = arith.addf %119, %121 : vector<8x64xf32>
    %123 = vector.extract_strided_slice %122 {offsets = [0, 0], sizes = [8, 32], strides = [1, 1]} : vector<8x64xf32> to vector<8x32xf32>
    %124 = vector.extract_strided_slice %122 {offsets = [0, 32], sizes = [8, 32], strides = [1, 1]} : vector<8x64xf32> to vector<8x32xf32>
    %cst_67 = arith.constant 5.400000e-01 : f32
    %125 = vector.broadcast %cst_67 : f32 to vector<8x32xf32>
    %126 = arith.addf %124, %125 : vector<8x32xf32>
    %cst_68 = arith.constant 0.000000e+00 : f32
    %127 = vector.broadcast %cst_68 : f32 to vector<8x32xf32>
    %128 = arith.maximumf %126, %127 : vector<8x32xf32>
    %129 = math.absf %126 : vector<8x32xf32>
    %cst_69 = arith.constant 0.000000e+00 : f32
    %130 = vector.broadcast %cst_69 : f32 to vector<8x32xf32>
    %131 = arith.subf %130, %129 : vector<8x32xf32>
    %132 = math.exp %131 : vector<8x32xf32>
    %133 = math.log1p %132 : vector<8x32xf32>
    %134 = arith.addf %128, %133 : vector<8x32xf32>
    %cst_70 = arith.constant 1.000000e-01 : f32
    %135 = vector.broadcast %cst_70 : f32 to vector<8x32xf32>
    %136 = arith.addf %134, %135 : vector<8x32xf32>
    %c0_71 = arith.constant 0 : index
    %c0_72 = arith.constant 0 : index
    %137 = vector.load %arg5[%c0_71, %c0_72] : memref<8x32xf32, #tpu.memory_space<vmem>>, vector<8x32xf32>
    %138 = arith.mulf %136, %137 : vector<8x32xf32>
    %139 = arith.addf %123, %138 : vector<8x32xf32>
    %140 = arith.truncf %116 : vector<8x64xf32> to vector<8x64xbf16>
    %c0_73 = arith.constant 0 : index
    %c0_74 = arith.constant 0 : index
    %141 = vector.load %arg15[%c0_73, %c0_74] : memref<64x192xbf16, #tpu.memory_space<vmem>>, vector<64x192xbf16>
    %cst_75 = arith.constant dense<0.000000e+00> : vector<8x192xf32>
    %142 = tpu.matmul %140, %141, %cst_75 {dimension_numbers = #tpu.dot_dimension_numbers<[1], [0], [0], [1], [0, 0, 1, 1], [], []>} : vector<8x64xbf16>, vector<64x192xbf16>, vector<8x192xf32> -> vector<8x192xf32>
    %143 = vector.broadcast %0 : vector<1x192xf32> to vector<8x192xf32>
    %144 = arith.addf %142, %143 : vector<8x192xf32>
    %145 = arith.truncf %87 : vector<8x64xf32> to vector<8x64xbf16>
    %c0_76 = arith.constant 0 : index
    %c0_77 = arith.constant 0 : index
    %146 = vector.load %arg16[%c0_76, %c0_77] : memref<64x192xbf16, #tpu.memory_space<vmem>>, vector<64x192xbf16>
    %cst_78 = arith.constant dense<0.000000e+00> : vector<8x192xf32>
    %147 = tpu.matmul %145, %146, %cst_78 {dimension_numbers = #tpu.dot_dimension_numbers<[1], [0], [0], [1], [0, 0, 1, 1], [], []>} : vector<8x64xbf16>, vector<64x192xbf16>, vector<8x192xf32> -> vector<8x192xf32>
    %148 = vector.broadcast %1 : vector<1x192xf32> to vector<8x192xf32>
    %149 = arith.addf %147, %148 : vector<8x192xf32>
    %150 = vector.extract_strided_slice %144 {offsets = [0, 0], sizes = [8, 64], strides = [1, 1]} : vector<8x192xf32> to vector<8x64xf32>
    %151 = vector.extract_strided_slice %149 {offsets = [0, 0], sizes = [8, 64], strides = [1, 1]} : vector<8x192xf32> to vector<8x64xf32>
    %152 = arith.addf %150, %151 : vector<8x64xf32>
    %cst_79 = arith.constant 5.000000e-01 : f32
    %153 = vector.broadcast %cst_79 : f32 to vector<8x64xf32>
    %154 = arith.mulf %153, %152 : vector<8x64xf32>
    %155 = math.tanh %154 : vector<8x64xf32>
    %cst_80 = arith.constant 1.000000e+00 : f32
    %156 = vector.broadcast %cst_80 : f32 to vector<8x64xf32>
    %157 = arith.addf %155, %156 : vector<8x64xf32>
    %cst_81 = arith.constant 5.000000e-01 : f32
    %158 = vector.broadcast %cst_81 : f32 to vector<8x64xf32>
    %159 = arith.mulf %158, %157 : vector<8x64xf32>
    %160 = vector.extract_strided_slice %144 {offsets = [0, 64], sizes = [8, 64], strides = [1, 1]} : vector<8x192xf32> to vector<8x64xf32>
    %161 = vector.extract_strided_slice %149 {offsets = [0, 64], sizes = [8, 64], strides = [1, 1]} : vector<8x192xf32> to vector<8x64xf32>
    %162 = arith.addf %160, %161 : vector<8x64xf32>
    %cst_82 = arith.constant 5.000000e-01 : f32
    %163 = vector.broadcast %cst_82 : f32 to vector<8x64xf32>
    %164 = arith.mulf %163, %162 : vector<8x64xf32>
    %165 = math.tanh %164 : vector<8x64xf32>
    %cst_83 = arith.constant 1.000000e+00 : f32
    %166 = vector.broadcast %cst_83 : f32 to vector<8x64xf32>
    %167 = arith.addf %165, %166 : vector<8x64xf32>
    %cst_84 = arith.constant 5.000000e-01 : f32
    %168 = vector.broadcast %cst_84 : f32 to vector<8x64xf32>
    %169 = arith.mulf %168, %167 : vector<8x64xf32>
    %170 = vector.extract_strided_slice %144 {offsets = [0, 128], sizes = [8, 64], strides = [1, 1]} : vector<8x192xf32> to vector<8x64xf32>
    %171 = vector.extract_strided_slice %149 {offsets = [0, 128], sizes = [8, 64], strides = [1, 1]} : vector<8x192xf32> to vector<8x64xf32>
    %172 = arith.mulf %159, %171 : vector<8x64xf32>
    %173 = arith.addf %170, %172 : vector<8x64xf32>
    %174 = math.tanh %173 : vector<8x64xf32>
    %cst_85 = arith.constant 1.000000e+00 : f32
    %175 = vector.broadcast %cst_85 : f32 to vector<8x64xf32>
    %176 = arith.subf %175, %169 : vector<8x64xf32>
    %177 = arith.mulf %176, %174 : vector<8x64xf32>
    %178 = arith.mulf %169, %87 : vector<8x64xf32>
    %179 = arith.addf %177, %178 : vector<8x64xf32>
    %cst_86 = arith.constant 0.000000e+00 : f32
    %180 = vector.broadcast %cst_86 : f32 to vector<8x64xf32>
    %181 = tpu.concatenate %31, %44, %47, %87, %123, %136, %139, %179, %180 in 1 : vector<8x32xf32>, vector<8x32xf32>, vector<8x32xf32>, vector<8x64xf32>, vector<8x32xf32>, vector<8x32xf32>, vector<8x32xf32>, vector<8x64xf32>, vector<8x64xf32> -> vector<8x384xf32>
    %c0_87 = arith.constant 0 : index
    %c0_88 = arith.constant 0 : index
    %182 = vector.load %arg18[%c0_87, %c0_88] : memref<8x384xf32, #tpu.memory_space<vmem>>, vector<8x384xf32>
    tpu.vector_store %arg18[%c0_87, %c0_88], %181 {strides = array<i32>} : memref<8x384xf32, #tpu.memory_space<vmem>>, vector<8x384xf32>,
    return
  }
}

</mosaic_0001>

<bundles_post_ra>
// kernel: tpu_custom_call.1
= control target key start
LH: loop header
LB: loop body
LE: loop exit
PB: predicated region body
PF: predicated region fallthrough
CT: control target
= control target key end

     0   :  { %s2284_s0 = inlined_call_operand.hbm [shape: f32[8,32], index: 0, kind: input, shape index: {}]   ;;  %s2285_s1 = inlined_call_operand.hbm [shape: f32[8,64], index: 1, kind: input, shape index: {}]   ;;  %s2286_s2 = inlined_call_operand.hbm [shape: f32[8,64], index: 2, kind: input, shape index: {}]   ;;  %s2287_s3 = inlined_call_operand.hbm [shape: f32[8,48], index: 3, kind: input, shape index: {}]   ;;  %s2288_s4 = inlined_call_operand.hbm [shape: f32[8,32], index: 4, kind: input, shape index: {}]   ;;  %s2289_s5 = inlined_call_operand.hbm [shape: f32[8,32], index: 5, kind: input, shape index: {}]   ;;  %s2290_s6 = inlined_call_operand.hbm [shape: bf16[32,64], index: 6, kind: input, shape index: {}]   ;;  %s2291_s7 = inlined_call_operand.hbm [shape: bf16[64,64], index: 7, kind: input, shape index: {}]   ;;  %s2292_s8 = inlined_call_operand.hbm [shape: bf16[64,64], index: 8, kind: input, shape index: {}]   ;;  %s2293_s9 = inlined_call_operand.hbm [shape: bf16[64,64], index: 9, kind: input, shape index: {}]   ;;  %s2294_s10 = inlined_call_operand.hbm [shape: bf16[48,64], index: 10, kind: input, shape index: {}]   ;;  %s2295_s11 = inlined_call_operand.hbm [shape: bf16[64,64], index: 11, kind: input, shape index: {}]   ;;  %s2296_s12 = inlined_call_operand.hbm [shape: bf16[64,64], index: 12, kind: input, shape index: {}]   ;;  %s2297_s13 = inlined_call_operand.hbm [shape: bf16[64,64], index: 13, kind: input, shape index: {}]   ;;  %s2298_s14 = inlined_call_operand.hbm [shape: bf16[64,64], index: 14, kind: input, shape index: {}]   ;;  %s2299_s15 = inlined_call_operand.hbm [shape: bf16[64,192], index: 15, kind: input, shape index: {}]   ;;  %s2300_s16 = inlined_call_operand.hbm [shape: bf16[64,192], index: 16, kind: input, shape index: {}]   ;;  %s2301_s17 = inlined_call_operand.hbm [shape: f32[9,192], index: 17, kind: input, shape index: {}]   ;;  %s2302_s18 = inlined_call_operand.hbm [shape: f32[8,384], index: 18, kind: output, shape index: {}]  }
   0x1   :  { %2303 = sst [smem:[#allocation43_spill]] %s2284_s0 }
   0x2   :  { %2304 = sst [smem:[#allocation44_spill]] %s2285_s1 }
   0x3   :  { %2305 = sst [smem:[#allocation45_spill]] %s2286_s2 }
   0x4   :  { %23 = vsyncpa [#allocation3], 0 }
   0x5   :  { %24 = vsyncpa [#allocation6], 0 }
   0x6   :  { %25 = vsyncpa [#allocation9], 0 }
   0x7   :  { %26 = vsyncpa [#allocation12], 0 }
   0x8   :  { %27 = vsyncpa [#allocation15], 0 }
   0x9   :  { %28 = vsyncpa [#allocation18], 0 }
   0xa   :  { %29 = vsyncpa [#allocation21], 0 }
   0xb   :  { %30 = vsyncpa [#allocation24], 0 }
   0xc   :  { %31 = vsyncpa [#allocation27], 0 }
   0xd   :  { %32 = vsyncpa [#allocation30], 0  ;;  %s2306_s29 = sld [smem:[#allocation44_spill]] }
  0x13   :  { %s50_s30 = sshll.u32 %s2306_s29, 4  ;;  %s51_s30 = int_to_ptr.hbm [resolvable:$true] %s50_s30 }
  0x14   :  { %33 = vsyncpa [#allocation4], 0  ;;  %s1924_s0 = smov [#allocation5]   ;;  %s72_s21 = sshll.u32 %s2287_s3, 4  ;;  %s73_s21 = int_to_ptr.hbm [resolvable:$true] %s72_s21 }
  0x15   :  { %s52_s19 = sshll.u32 %s1924_s0, 4  ;;  %s1925_s22 = smov [#allocation8]   ;;  %s53_s19 = int_to_ptr.vmem [resolvable:$true] %s52_s19 }
  0x16   :  { %55 = dma.hbm_to_vmem [thread:$0]  %s51_s30, 128, %s53_s19, [#allocation6]  }
  0x17   :  { %s74_s2 = sshll.u32 %s1925_s22, 4  ;;  %s94_s25 = sshll.u32 %s2289_s5, 4  ;;  %s75_s2 = int_to_ptr.vmem [resolvable:$true] %s74_s2  ;;  %s95_s25 = int_to_ptr.hbm [resolvable:$true] %s94_s25 }
  0x18   :  { %77 = dma.hbm_to_vmem [thread:$0]  %s73_s21, 128, %s75_s2, [#allocation9]  }
  0x19   :  { %s1926_s26 = smov [#allocation11]   ;;  %s117_s0 = sshll.u32 %s2291_s7, 4  ;;  %s118_s0 = int_to_ptr.hbm [resolvable:$true] %s117_s0 }
  0x1a   :  { %s96_s27 = sshll.u32 %s1926_s26, 4  ;;  %s1927_s3 = smov [#allocation14]   ;;  %s97_s27 = int_to_ptr.vmem [resolvable:$true] %s96_s27 }
  0x1b   :  { %99 = dma.hbm_to_vmem [thread:$0]  %s95_s25, 128, %s97_s27, [#allocation12]  }
  0x1c   :  { %s119_s30 = sshll.u32 %s1927_s3, 4  ;;  %s143_s20 = sshll.u32 %s2293_s9, 4  ;;  %s120_s30 = int_to_ptr.vmem [resolvable:$true] %s119_s30  ;;  %s144_s20 = int_to_ptr.hbm [resolvable:$true] %s143_s20 }
  0x1d   :  { %s1928_s5 = smov 64   ;;  %s1929_s22 = smov 4  }
  0x1e   :  { %125 = dma.hbm_to_vmem [thread:$0]  %s118_s0, 512, %s120_s30, [#allocation15], %s1928_s5, %s1928_s5, %s1929_s22  }
  0x1f   :  { %s169_s7 = sshll.u32 %s2295_s11, 4  ;;  %s1930_s23 = smov [#allocation17]   ;;  %s170_s7 = int_to_ptr.hbm [resolvable:$true] %s169_s7 }
  0x20   :  { %s145_s24 = sshll.u32 %s1930_s23, 4  ;;  %s1931_s9 = smov [#allocation20]   ;;  %s146_s24 = int_to_ptr.vmem [resolvable:$true] %s145_s24 }
  0x21   :  { %151 = dma.hbm_to_vmem [thread:$0]  %s144_s20, 512, %s146_s24, [#allocation18], %s1928_s5, %s1928_s5, %s1929_s22  }
  0x22   :  { %s171_s25 = sshll.u32 %s1931_s9, 4  ;;  %s195_s28 = sshll.u32 %s2297_s13, 4  ;;  %s172_s25 = int_to_ptr.vmem [resolvable:$true] %s171_s25  ;;  %s196_s28 = int_to_ptr.hbm [resolvable:$true] %s195_s28 }
  0x23   :  { %177 = dma.hbm_to_vmem [thread:$0]  %s170_s7, 512, %s172_s25, [#allocation21], %s1928_s5, %s1928_s5, %s1929_s22  }
  0x24   :  { %s221_s0 = sshll.u32 %s2299_s15, 4  ;;  %s1932_s3 = smov [#allocation23]   ;;  %s222_s0 = int_to_ptr.hbm [resolvable:$true] %s221_s0 }
  0x25   :  { %s197_s30 = sshll.u32 %s1932_s3, 4  ;;  %s1933_s19 = smov [#allocation26]   ;;  %s198_s30 = int_to_ptr.vmem [resolvable:$true] %s197_s30 }
  0x26   :  { %203 = dma.hbm_to_vmem [thread:$0]  %s196_s28, 512, %s198_s30, [#allocation24], %s1928_s5, %s1928_s5, %s1929_s22  }
  0x27   :  { %s223_s13 = sshll.u32 %s1933_s19, 4  ;;  %s1934_s1 = smov 128   ;;  %s224_s13 = int_to_ptr.vmem [resolvable:$true] %s223_s13 }
  0x28   :  { %s1935_s20 = smov 8   ;;  %s2307_s15 = sld [smem:[#allocation43_spill]] }
  0x29   :  { %229 = dma.hbm_to_vmem [thread:$0]  %s222_s0, 1024, %s224_s13, [#allocation27], %s1934_s1, %s1934_s1, %s1935_s20  }
  0x2a   :  { %s1936_s23 = smov [#allocation2]   ;;  %s2308_s26 = sld [smem:[#allocation45_spill]] }
  0x2b   :  { %s41_s24 = sshll.u32 %s1936_s23, 4  ;;  %s1937_s28 = smov [#allocation7]   ;;  %s42_s24 = int_to_ptr.vmem [resolvable:$true] %s41_s24 }
  0x2c   :  { %s63_s11 = sshll.u32 %s1937_s28, 4  ;;  %s83_s0 = sshll.u32 %s2288_s4, 4  ;;  %s64_s11 = int_to_ptr.vmem [resolvable:$true] %s63_s11  ;;  %s84_s0 = int_to_ptr.hbm [resolvable:$true] %s83_s0 }
  0x2d   :  { %s104_s13 = sshll.u32 %s2290_s6, 4  ;;  %s1938_s21 = smov [#allocation10]   ;;  %s105_s13 = int_to_ptr.hbm [resolvable:$true] %s104_s13 }
  0x2e   :  { %s39_s7 = sshll.u32 %s2307_s15, 4  ;;  %s85_s2 = sshll.u32 %s1938_s21, 4  ;;  %s40_s7 = int_to_ptr.hbm [resolvable:$true] %s39_s7  ;;  %s86_s2 = int_to_ptr.vmem [resolvable:$true] %s85_s2 }
  0x2f   :  { %44 = dma.hbm_to_vmem [thread:$0]  %s40_s7, 128, %s42_s24, [#allocation3]  }
  0x30   :  { %s61_s27 = sshll.u32 %s2308_s26, 4  ;;  %s1939_s15 = smov [#allocation13]   ;;  %s62_s27 = int_to_ptr.hbm [resolvable:$true] %s61_s27 }
  0x31   :  { %66 = dma.hbm_to_vmem [thread:$0]  %s62_s27, 128, %s64_s11, [#allocation6]  }
  0x32   :  { %88 = dma.hbm_to_vmem [thread:$0]  %s84_s0, 128, %s86_s2, [#allocation9]  }
  0x33   :  { %s106_s7 = sshll.u32 %s1939_s15, 4  ;;  %s130_s9 = sshll.u32 %s2292_s8, 4  ;;  %s107_s7 = int_to_ptr.vmem [resolvable:$true] %s106_s7  ;;  %s131_s9 = int_to_ptr.hbm [resolvable:$true] %s130_s9 }
  0x34   :  { %112 = dma.hbm_to_vmem [thread:$0]  %s105_s13, 256, %s107_s7, [#allocation12], %s1928_s5, %s1928_s5, %s1929_s22  }
  0x35   :  { %s156_s6 = sshll.u32 %s2294_s10, 4  ;;  %s1940_s26 = smov [#allocation16]   ;;  %s157_s6 = int_to_ptr.hbm [resolvable:$true] %s156_s6 }
  0x36   :  { %s132_s27 = sshll.u32 %s1940_s26, 4  ;;  %s1941_s28 = smov [#allocation19]   ;;  %s133_s27 = int_to_ptr.vmem [resolvable:$true] %s132_s27 }
  0x37   :  { %138 = dma.hbm_to_vmem [thread:$0]  %s131_s9, 512, %s133_s27, [#allocation15], %s1928_s5, %s1928_s5, %s1929_s22  }
  0x38   :  { %s158_s8 = sshll.u32 %s1941_s28, 4  ;;  %s182_s3 = sshll.u32 %s2296_s12, 4  ;;  %s159_s8 = int_to_ptr.vmem [resolvable:$true] %s158_s8  ;;  %s183_s3 = int_to_ptr.hbm [resolvable:$true] %s182_s3 }
  0x39   :  { %164 = dma.hbm_to_vmem [thread:$0]  %s157_s6, 384, %s159_s8, [#allocation18], %s1928_s5, %s1928_s5, %s1929_s22  }
  0x3a   :  { %s208_s30 = sshll.u32 %s2298_s14, 4  ;;  %s1942_s19 = smov [#allocation22]   ;;  %s209_s30 = int_to_ptr.hbm [resolvable:$true] %s208_s30 }
  0x3b   :  { %s184_s13 = sshll.u32 %s1942_s19, 4  ;;  %s1943_s21 = smov [#allocation25]   ;;  %s185_s13 = int_to_ptr.vmem [resolvable:$true] %s184_s13 }
  0x3c   :  { %190 = dma.hbm_to_vmem [thread:$0]  %s183_s3, 512, %s185_s13, [#allocation21], %s1928_s5, %s1928_s5, %s1929_s22  }
  0x3d   :  { %s210_s12 = sshll.u32 %s1943_s21, 4  ;;  %s234_s7 = sshll.u32 %s2300_s16, 4  ;;  %s211_s12 = int_to_ptr.vmem [resolvable:$true] %s210_s12  ;;  %s235_s7 = int_to_ptr.hbm [resolvable:$true] %s234_s7 }
  0x3e   :  { %216 = dma.hbm_to_vmem [thread:$0]  %s209_s30, 512, %s211_s12, [#allocation24], %s1928_s5, %s1928_s5, %s1929_s22  }
  0x3f   :  { %s247_s24 = sshll.u32 %s2301_s17, 4  ;;  %s1944_s9 = smov [#allocation28]   ;;  %s248_s24 = int_to_ptr.hbm [resolvable:$true] %s247_s24 }
  0x40   :  { %s236_s4 = sshll.u32 %s1944_s9, 4  ;;  %s1945_s25 = smov [#allocation29]   ;;  %s237_s4 = int_to_ptr.vmem [resolvable:$true] %s236_s4 }
  0x41   :  { %242 = dma.hbm_to_vmem [thread:$0]  %s235_s7, 1024, %s237_s4, [#allocation27], %s1934_s1, %s1934_s1, %s1935_s20  }
  0x42   :  { %s249_s16 = sshll.u32 %s1945_s25, 4  ;;  %s1946_s6 = smov 256   ;;  %s250_s16 = int_to_ptr.vmem [resolvable:$true] %s249_s16 }
  0x43   :  { %s1947_s26 = smov 16  }
  0x44   :  { %255 = dma.hbm_to_vmem [thread:$0]  %s248_s24, 512, %s250_s16, [#allocation30], %s1946_s6, %s1946_s6, %s1947_s26  }
  0x45   :  { %1902 = dma.done.wait [#allocation3], 128  }
  0x46   :  { %1903 = vsyncadd [#allocation3], 4294967168 }
  0x47   :  { %1904 = dma.done.wait [#allocation6], 256  }
  0x48   :  { %1905 = vsyncadd [#allocation6], 4294967040 }
  0x49   :  { %1906 = dma.done.wait [#allocation9], 256  }
  0x4a   :  { %1907 = vsyncadd [#allocation9], 4294967040 }
  0x4b   :  { %1908 = dma.done.wait [#allocation12], 384  }
  0x4c   :  { %1909 = vsyncadd [#allocation12], 4294966912 }
  0x4d   :  { %1910 = dma.done.wait [#allocation15], 1024  }
  0x4e   :  { %1911 = vsyncadd [#allocation15], 4294966272 }
  0x4f   :  { %1912 = dma.done.wait [#allocation18], 896  }
  0x50   :  { %1913 = vsyncadd [#allocation18], 4294966400 }
  0x51   :  { %1914 = dma.done.wait [#allocation21], 1024  }
  0x52   :  { %1915 = vsyncadd [#allocation21], 4294966272 }
  0x53   :  { %1916 = dma.done.wait [#allocation24], 1024  }
  0x54   :  { %1917 = vsyncadd [#allocation24], 4294966272 }
  0x55   :  { %1918 = dma.done.wait [#allocation27], 2048  }
  0x56   :  { %1919 = vsyncadd [#allocation27], 4294965248 }
  0x57   :  { %1920 = dma.done.wait [#allocation30], 512  }
  0x58   :  { %1921 = vsyncadd [#allocation30], 4294966784  ;;  %v1359_v0 = vld [vmem:[#allocation14 + $0x18] sm:$0xff]  ;;  %v1358_v2 = vld [vmem:[#allocation14 + $0x10] sm:$0xff]  ;;  %vm403_vm0 = vcmask 261120   ;;  %vm374_vm1 = vcmask 523264  }
  0x59   :  { %v1355_v1 = vld [vmem:[#allocation13 + $0x8] sm:$0xff]  ;;  %382 = vmatpush.bf16.msra.mxu0 %v1359_v0  ;;  %v1354_v3 = vld [vmem:[#allocation13] sm:$0xff]  ;;  %v333_v4 = vld [vmem:[#allocation2] sm:$0xff]  ;;  %vm761_vm2 = vcmask 392192   ;;  %s1948_s17 = smov 32   ;;  %s1949_s22 = smov 96  }
  0x5a   :  { %413 = vmatpush.bf16.msra.mxu1 %v1355_v1  ;;  %v336_v5 = vpack.c.bf16 %v333_v4, %v333_v4  ;;  %v1357_v6 = vld [vmem:[#allocation14 + $0x8] sm:$0xff]  ;;  %v1356_v7 = vld [vmem:[#allocation14] sm:$0xff]  ;;  %v335_v8 = vld [vmem:[#allocation7] sm:$0xff]  ;;  %vm1106_vm5 = vcmask 785408   ;;  %s1122_s28 = sshll.u32 %s2302_s18, 4  ;;  %s1123_s28 = int_to_ptr.hbm [resolvable:$true] %s1122_s28 }
  0x5b   :  { %v341_v9 = vpack.c.bf16 %v335_v8, %v335_v8  ;;  %v1363_v10 = vld [vmem:[#allocation16 + $0x18] sm:$0xff]  ;;  %v1362_v11 = vld [vmem:[#allocation16 + $0x10] sm:$0xff]  ;;  %v1361_v12 = vld [vmem:[#allocation16 + $0x8] sm:$0xff] }
  0x5c   :  { %464 = vmatpush.bf16.msra.mxu2 %v1363_v10  ;;  %v1360_v13 = vld [vmem:[#allocation16] sm:$0xff]  ;;  %v1261_v14 = vld [vmem:[#allocation28 + $0x30] sm:$0xf]  ;;  %v1383_v15 = vld [vmem:[#allocation28 + $0x34] sm:$0xf0] }
  0x5d   :  { %383 = vmatpush.bf16.msra.mxu0 %v1358_v2  ;;  %v1253_v16 = vld [vmem:[#allocation28 + $0x20] sm:$0xf]  ;;  %v2135_v17 = vor.u32 %v1383_v15, %v1261_v14  ;;  %v1381_v18 = vld [vmem:[#allocation28 + $0x24] sm:$0xf0]  ;;  %v1227_v20 = vld [vmem:[#allocation26 + $0x30] sm:$0xf] }
  0x5e   :  { %414 = vmatpush.bf16.msra.mxu1 %v1354_v3  ;;  %v1367_v19 = vld [vmem:[#allocation17 + $0x18] sm:$0xff]  ;;  %v1375_v21 = vld [vmem:[#allocation26 + $0x34] sm:$0xf0]  ;;  %v1374_v22 = vld [vmem:[#allocation26 + $0x34] sm:$0xf]  ;;  %v2138_v24 = vor.u32 %v1381_v18, %v1253_v16 }
  0x5f   :  { %v1229_v23 = vld [vmem:[#allocation26 + $0x38] sm:$0xf0]  ;;  %515 = vmatpush.bf16.msra.mxu3 %v1367_v19  ;;  %v2140_v25 = vor.u32 %v1375_v21, %v1227_v20  ;;  %v1245_v27 = vld [vmem:[#allocation28 + $0x10] sm:$0xf]  ;;  %v1379_v28 = vld [vmem:[#allocation28 + $0x14] sm:$0xf0] }
  0x60   :  { %465 = vmatpush.bf16.msra.mxu2 %v1362_v11  ;;  %v2142_v26 = vor.u32 %v1374_v22, %v1229_v23  ;;  %v1366_v29 = vld [vmem:[#allocation17 + $0x10] sm:$0xff]  ;;  %v1219_v30 = vld [vmem:[#allocation26 + $0x20] sm:$0xf]  ;;  %v1373_v31 = vld [vmem:[#allocation26 + $0x24] sm:$0xf0]  ;;  %v2151_v36 = vor.u32 %v1379_v28, %v1245_v27 }
  0x61   :  { %1166 = vmatmul.msk.bf16.vlgmr.msra.gmra.mxu1 %vm403_vm0, %v336_v5  ;;  %384 = vmatpush.bf16.msra.mxu0 %v1357_v6  ;;  %v1372_v32 = vld [vmem:[#allocation26 + $0x24] sm:$0xf]  ;;  %v2146_v33 = vor.u32 %v1373_v31, %v1219_v30  ;;  %v1221_v34 = vld [vmem:[#allocation26 + $0x28] sm:$0xf0]  ;;  %v1237_v37 = vld [vmem:[#allocation28] sm:$0xf] }
  0x62   :  { %609 = vmatpush.bf16.msrb.mxu1 %v2140_v25  ;;  %v2148_v35 = vor.u32 %v1372_v32, %v1221_v34  ;;  %v1377_v38 = vld [vmem:[#allocation28 + $0x4] sm:$0xf0]  ;;  %v420_v42 = vld [vmem:[#allocation29] ss:$0 sm:$0xff]  ;;  %v1211_v49 = vld [vmem:[#allocation26 + $0x10] sm:$0xf] }
  0x63   :  { %516 = vmatpush.bf16.msra.mxu3 %v1366_v29  ;;  %v2156_v39 = vor.u32 %v1377_v38, %v1237_v37  ;;  %v1371_v50 = vld [vmem:[#allocation26 + $0x14] sm:$0xf0]  ;;  %v1370_v51 = vld [vmem:[#allocation26 + $0x14] sm:$0xf]  ;;  %v1213_v54 = vld [vmem:[#allocation26 + $0x18] sm:$0xf0] }
  0x64   :  { %466 = vmatpush.bf16.msra.mxu2 %v1361_v12  ;;  %v1365_v52 = vld [vmem:[#allocation17 + $0x8] sm:$0xff]  ;;  %v2160_v53 = vor.u32 %v1371_v50, %v1211_v49  ;;  %v2164_v56 = vor.u32 %v1370_v51, %v1213_v54  ;;  %v1203_v58 = vld [vmem:[#allocation26] sm:$0xf]  ;;  %v1369_v59 = vld [vmem:[#allocation26 + $0x4] sm:$0xf0] }
  0x65   :  { %385 = vmatpush.bf16.msra.mxu0 %v1356_v7  ;;  %v2162_v55 = vld [vmem:[#allocation5] sm:$0xff]  ;;  %v1368_v60 = vld [vmem:[#allocation26 + $0x4] sm:$0xf]  ;;  %v1364_v61 = vld [vmem:[#allocation17] sm:$0xff]  ;;  %v2171_v62 = vor.u32 %v1369_v59, %v1203_v58 }
  0x66   :  { %610 = vmatpush.bf16.msrb.mxu1 %v2146_v33  ;;  %v631_v57 = vpack.c.bf16 %v2162_v55, %v2162_v55  ;;  %v1205_v63 = vld [vmem:[#allocation26 + $0x8] sm:$0xf0]  ;;  %v1382_v1 = vld [vmem:[#allocation28 + $0x34] sm:$0xf]  ;;  %v1263_v2 = vld [vmem:[#allocation28 + $0x38] sm:$0xf0] }
  0x67   :  { %517 = vmatpush.bf16.msra.mxu3 %v1365_v52  ;;  %v2173_v0 = vor.u32 %v1368_v60, %v1205_v63  ;;  %v2177_v3 = vor.u32 %v1382_v1, %v1263_v2  ;;  %v1380_v4 = vld [vmem:[#allocation28 + $0x24] sm:$0xf]  ;;  %v1255_v5 = vld [vmem:[#allocation28 + $0x28] sm:$0xf0]  ;;  %v1378_v7 = vld [vmem:[#allocation28 + $0x14] sm:$0xf] }
  0x68   :  { %1157 = vmatmul.msk.bf16.vlgmr.msra.gmra.mxu0 %vm374_vm1, %v341_v9  ;;  %467 = vmatpush.bf16.msra.mxu2 %v1360_v13  ;;  %v2180_v6 = vor.u32 %v1380_v4, %v1255_v5  ;;  %v1247_v8 = vld [vmem:[#allocation28 + $0x18] sm:$0xf0]  ;;  %v1376_v10 = vld [vmem:[#allocation28 + $0x4] sm:$0xf]  ;;  %v1239_v11 = vld [vmem:[#allocation28 + $0x8] sm:$0xf0] }
  0x69   :  { %622 = vmatpush.bf16.msrb.mxu0 %v2142_v26  ;;  %v2183_v9 = vor.u32 %v1378_v7, %v1247_v8  ;;  %v2186_v12 = vor.u32 %v1376_v10, %v1239_v11  ;;  %v432_v13 = vld [vmem:[#allocation29 + $0x1] ss:$0 sm:$0xff]  ;;  %v2193_v22 = vld [vmem:[#allocation29 + $0x10] ss:$8 sm:$0x3]  ;;  %v1392_v7 = vld [vmem:[#allocation22 + $0x8] sm:$0xff] }
  0x6a   :  { %611 = vmatpush.bf16.msrb.mxu1 %v2160_v53  ;;  %v2195_v23 = vld [vmem:[#allocation29 + $0x7] ss:$8 sm:$0x3]  ;;  %v641_v27 = vperm.slane %v2193_v22, 0  ;;  %v642_v49 = vperm.slane %v2193_v22, 1  ;;  %v1394_v1 = vld [vmem:[#allocation22 + $0x18] sm:$0xff] }
  0x6b   :  { %518 = vmatpush.bf16.msra.mxu3 %v1364_v61  ;;  %v561_v28 = vperm.slane %v2195_v23, 0  ;;  %v562_v50 = vperm.slane %v2195_v23, 1  ;;  %v1390_v2 = vld [vmem:[#allocation20 + $0x18] sm:$0xff]  ;;  %v1393_v4 = vld [vmem:[#allocation22 + $0x10] sm:$0xff]  ;;  %v1388_v8 = vld [vmem:[#allocation20 + $0x8] sm:$0xff] }
  0x6c   :  { %692 = vmatpush.bf16.msrb.mxu2 %v2135_v17  ;;  %v1389_v5 = vld [vmem:[#allocation20 + $0x10] sm:$0xff]  ;;  %v742_v10 = vld [vmem:[#allocation29 + $0x3] ss:$0 sm:$0xff] }
  0x6d   :  { %623 = vmatpush.bf16.msrb.mxu0 %v2148_v35 }
  0x6e   :  { %612 = vmatpush.bf16.msrb.mxu1 %v2171_v62 }
  0x6f   :  { %705 = vmatpush.bf16.msrb.mxu3 %v2177_v3 }
  0x70   :  { %693 = vmatpush.bf16.msrb.mxu2 %v2138_v24 }
  0x71   :  { %624 = vmatpush.bf16.msrb.mxu0 %v2164_v56 }
  0x73   :  { %706 = vmatpush.bf16.msrb.mxu3 %v2180_v6 }
  0x74   :  { %694 = vmatpush.bf16.msrb.mxu2 %v2151_v36 }
  0x75   :  { %625 = vmatpush.bf16.msrb.mxu0 %v2173_v0 }
  0x77   :  { %707 = vmatpush.bf16.msrb.mxu3 %v2183_v9 }
  0x78   :  { %695 = vmatpush.bf16.msrb.mxu2 %v2156_v39 }
  0x79   :  { %828 = vmatpush.bf16.msra.mxu0 %v1394_v1  ;;  %v1401_v1 = vld [vmem:[#allocation25 + $0x10] sm:$0xff] }
  0x7b   :  { %708 = vmatpush.bf16.msrb.mxu3 %v2186_v12 }
  0x7d   :  { %829 = vmatpush.bf16.msra.mxu0 %v1393_v4 }
  0x81   :  { %830 = vmatpush.bf16.msra.mxu0 %v1392_v7 }
  0xde   :  { %v416_v40 = vpop.f32.mrf.mxu1 }
  0xe5   :  { %v387_v41 = vpop.f32.mrf.mxu0 }
  0xe6   :  { %v418_v43 = vpop.f32.mrf.mxu1  ;;  %v417_v44 = vadd.f32 %v416_v40, %v387_v41 }
  0xe8   :  { %v421_v45 = vadd.f32 %v420_v42, %v417_v44  ;;  %v1386_v42 = vld [vmem:[#allocation19 + $0x10] sm:$0xff]  ;;  %v1385_v44 = vld [vmem:[#allocation19 + $0x8] sm:$0xff] }
  0xe9   :  { %770 = vmatpush.bf16.msra.mxu1 %v1386_v42 }
  0xea   :  { %v422_v46 = vmax.f32 %v421_v45, 0.0 }
  0xec   :  { %v423_v47 = vpack.c.bf16 %v422_v46, %v422_v46  ;;  %v1384_v46 = vld [vmem:[#allocation19] sm:$0xff] }
  0xed   :  { %v389_v48 = vpop.f32.mrf.mxu0  ;;  %771 = vmatpush.bf16.msra.mxu1 %v1385_v44 }
  0xee   :  { %1183 = vmatmul.msk.bf16.vlgmr.msra.gmra.mxu2 %vm374_vm1, %v423_v47  ;;  %v734_v47 = vld [vmem:[#allocation8] sm:$0xff] }
  0xef   :  { %v735_v51 = vpack.c.bf16 %v734_v47, %v734_v47  ;;  %871 = vmatpush.bf16.msra.mxu2 %v1390_v2  ;;  %v1400_v2 = vld [vmem:[#allocation25 + $0x8] sm:$0xff] }
  0xf1   :  { %772 = vmatpush.bf16.msra.mxu1 %v1384_v46 }
  0xf3   :  { %872 = vmatpush.bf16.msra.mxu2 %v1389_v5  ;;  %v880_v5 = vld [vmem:[#allocation29 + $0x4] ss:$0 sm:$0xff] }
  0xf7   :  { %873 = vmatpush.bf16.msra.mxu2 %v1388_v8 }
  0xfe   :  { %1267 = vmatmul.msk.bf16.vlgmr.msrb.gmra.mxu2 %vm374_vm1, %v631_v57 }
 0x171   :  { %v469_v14 = vpop.f32.mrf.mxu2 }
 0x172   :  { %v470_v15 = vadd.f32 %v469_v14, %v432_v13 }
 0x174   :  { %v473_v16 = vmax.f32 %v470_v15, 0.0  ;;  %v1391_v15 = vld [vmem:[#allocation22] sm:$0xff] }
 0x175   :  { %831 = vmatpush.bf16.msra.mxu0 %v1391_v15 }
 0x176   :  { %v474_v18 = vpack.c.bf16 %v473_v16, %v473_v16  ;;  %v1387_v16 = vld [vmem:[#allocation20] sm:$0xff] }
 0x177   :  { %874 = vmatpush.bf16.msra.mxu2 %v1387_v16 }
 0x178   :  { %1200 = vmatmul.msk.bf16.vlgmr.msra.gmra.mxu3 %vm374_vm1, %v474_v18  ;;  %1233 = vmatmul.msk.bf16.vlgmr.msrb.gmra.mxu1 %vm374_vm1, %v474_v18 }
 0x179   :  { %1234 = vmatmul.msk.bf16.vlgmr.msrb.gmra.mxu0 %vm374_vm1, %v474_v18  ;;  %v471_v19 = vpop.f32.mrf.mxu2 }
 0x17a   :  { %1016 = vmatpush.bf16.msrb.mxu0 %v2140_v25  ;;  %v541_v25 = vld [vmem:[#allocation10] sm:$0xff] }
 0x17b   :  { %1029 = vmatpush.bf16.msrb.mxu2 %v2142_v26  ;;  %v483_v26 = vld [vmem:[#allocation29 + $0x2] ss:$0 sm:$0xff] }
 0x17e   :  { %1017 = vmatpush.bf16.msrb.mxu0 %v2146_v33 }
 0x17f   :  { %1030 = vmatpush.bf16.msrb.mxu2 %v2148_v35 }
 0x181   :  { %v697_v20 = vpop.f32.mrf.mxu2 }
 0x182   :  { %v698_v29 = vadd.f32 %v697_v20, %v641_v27  ;;  %1018 = vmatpush.bf16.msrb.mxu0 %v2160_v53 }
 0x183   :  { %1031 = vmatpush.bf16.msrb.mxu2 %v2164_v56  ;;  %v1398_v56 = vld [vmem:[#allocation23 + $0x18] sm:$0xff] }
 0x184   :  { %924 = vmatpush.bf16.msra.mxu3 %v1398_v56 }
 0x186   :  { %1019 = vmatpush.bf16.msrb.mxu0 %v2171_v62 }
 0x187   :  { %1032 = vmatpush.bf16.msrb.mxu2 %v2173_v0 }
 0x188   :  { %1268 = vmatmul.msk.bf16.vlgmr.msrb.gmra.mxu3 %vm374_vm1, %v631_v57  ;;  %1281 = vmatmul.msk.bf16.vlgmr.msra.gmra.mxu1 %vm761_vm2, %v735_v51 }
 0x189   :  { %v699_v21 = vpop.f32.mrf.mxu2 }
 0x1f5   :  { %v614_v30 = vpop.f32.mrf.mxu1 }
 0x1f6   :  { %v615_v31 = vadd.f32 %v614_v30, %v561_v28  ;;  %v627_v32 = vpop.f32.mrf.mxu0 }
 0x1f7   :  { %v628_v58 = vadd.f32 %v627_v32, %v562_v50 }
 0x1f8   :  { %v714_v34 = vadd.f32 %v698_v29, %v615_v31 }
 0x1fa   :  { %v715_v37 = vmul.f32 0.5, %v714_v34 }
 0x1fb   :  { %v2203_v38 = vpop.f32.mrf.mxu3 }
 0x1fc   :  { %1430 = vtanh.f32 %v715_v37  ;;  %v2230_v33 = vadd.f32 %v2203_v38, %v483_v26 }
 0x1fd   :  { %v616_v40 = vpop.f32.mrf.mxu1 }
 0x1fe   :  { %v629_v41 = vpop.f32.mrf.mxu0  ;;  %v524_v35 = vadd.f32 0.54, %v2230_v33 }
 0x200   :  { %v526_v34 = vand.u32 2147483647, %v524_v35  ;;  %v525_v47 = vmax.f32 %v524_v35, 0.0 }
 0x202   :  { %v1431_v45 = vpop.eup %1430  ;;  %v527_v53 = vsub.f32 0.0, %v526_v34 }
 0x203   :  { %v522_v43 = vpop.f32.mrf.mxu3  ;;  %v717_v48 = vadd.f32 1.0, %v1431_v45 }
 0x204   :  { %v528_v37 = vmul.f32 1.442695, %v527_v53 }
 0x205   :  { %v718_v54 = vmul.f32 0.5, %v717_v48  ;;  %v774_v13 = vpop.f32.mrf.mxu1 }
 0x206   :  { %v775_v14 = vadd.f32 %v774_v13, %v742_v10 }
 0x207   :  { %v722_v19 = vsub.f32 1.0, %v718_v54 }
 0x208   :  { %v778_v18 = vmax.f32 %v775_v14, 0.0 }
 0x20b   :  { %v710_v52 = vpop.f32.mrf.mxu3 }
 0x20c   :  { %v711_v57 = vadd.f32 %v710_v52, %v642_v49 }
 0x20d   :  { %v776_v21 = vpop.f32.mrf.mxu1 }
 0x20e   :  { %v719_v59 = vmul.f32 %v718_v54, %v711_v57 }
 0x210   :  { %v720_v60 = vadd.f32 %v719_v59, %v628_v58  ;;  %v1397_v59 = vld [vmem:[#allocation23 + $0x10] sm:$0xff] }
 0x211   :  { %925 = vmatpush.bf16.msra.mxu3 %v1397_v59 }
 0x212   :  { %1432 = vtanh.f32 %v720_v60  ;;  %v1396_v60 = vld [vmem:[#allocation23 + $0x8] sm:$0xff] }
 0x213   :  { %v712_v61 = vpop.f32.mrf.mxu3  ;;  %1434 = vpow2.f32 %v528_v37 }
 0x214   :  { %v1395_v61 = vld [vmem:[#allocation23] sm:$0xff] }
 0x215   :  { %926 = vmatpush.bf16.msra.mxu3 %v1396_v60 }
 0x218   :  { %v1433_v63 = vpop.eup %1432 }
 0x219   :  { %724 = vrot.lane.b32.xlu0 %v1433_v63, %s1928_s5  ;;  %v1435_v40 = vpop.eup %1434  ;;  %927 = vmatpush.bf16.msra.mxu3 %v1395_v61  ;;  %v1402_v63 = vld [vmem:[#allocation25 + $0x18] sm:$0xff] }
 0x21a   :  { %v530_v62 = vadd.f32 1.0, %v1435_v40  ;;  %v533_v0 = vmul.f32 -0.5, %v1435_v40  ;;  %v536_v43 = vand.u32 2147483647, %v1435_v40  ;;  %975 = vmatpush.bf16.msrb.mxu1 %v1402_v63 }
 0x21c   :  { %1436 = vlog2.f32 %v530_v62  ;;  %v534_v42 = vadd.f32 1.0, %v533_v0  ;;  %vm537_vm3 = vcmp.lt.f32.partialorder %v536_v43, 0.0004427343 }
 0x21d   :  { %1042 = vmatpush.bf16.msrb.mxu3 %v2135_v17  ;;  %v1399_v17 = vld [vmem:[#allocation25] sm:$0xff] }
 0x21e   :  { %v535_v45 = vmul.f32 %v1435_v40, %v534_v42  ;;  %976 = vmatpush.bf16.msrb.mxu1 %v1401_v1 }
 0x221   :  { %729 = vrot.lane.b32.xlu0 %v2162_v55, %s1928_s5  ;;  %v788_v55 = vpack.c.bf16 %v778_v18, %v778_v18  ;;  %1043 = vmatpush.bf16.msrb.mxu3 %v2138_v24  ;;  %v1001_v24 = vld [vmem:[#allocation11] sm:$0xff] }
 0x222   :  { %v1437_v41 = vpop.eup %1436  ;;  %977 = vmatpush.bf16.msrb.mxu1 %v1400_v2  ;;  %1003 = vrot.lane.b32.xlu2 %v1001_v24, %s1948_s17 }
 0x223   :  { %1298 = vmatmul.msk.bf16.vlgmr.msra.gmra.mxu0 %vm374_vm1, %v788_v55  ;;  %v532_v44 = vmul.f32 0.6931472, %v1437_v41 }
 0x225   :  { %v538_v46 = vsel %vm537_vm3, %v535_v45, %v532_v44  ;;  %1044 = vmatpush.bf16.msrb.mxu3 %v2151_v36  ;;  %v892_v36 = vld [vmem:[#allocation29 + $0x5] ss:$0 sm:$0xff] }
 0x226   :  { %v539_v48 = vadd.f32 %v538_v46, %v525_v47  ;;  %978 = vmatpush.bf16.msrb.mxu1 %v1399_v17 }
 0x228   :  { %v2234_v52 = vadd.f32 0.1, %v539_v48 }
 0x229   :  { %1045 = vmatpush.bf16.msrb.mxu3 %v2156_v39 }
 0x22a   :  { %1055 = vmatpush.bf16.msra.mxu1 %v2177_v3 }
 0x22e   :  { %1056 = vmatpush.bf16.msra.mxu1 %v2180_v6 }
 0x232   :  { %1057 = vmatpush.bf16.msra.mxu1 %v2183_v9 }
 0x236   :  { %1058 = vmatpush.bf16.msra.mxu1 %v2186_v12  ;;  %v943_v12 = vld [vmem:[#allocation29 + $0x6] ss:$0 sm:$0xff] }
 0x27c   :  { %v1004_v23 = vpop.permute.xlu2 %1003 }
 0x28b   :  { %v725_v11 = vpop.permute.xlu0 %724 }
 0x28c   :  { %v727_v29 = vmul.f32 %v725_v11, %v722_v19 }
 0x293   :  { %v730_v20 = vpop.permute.xlu0 %729 }
 0x294   :  { %v732_v30 = vmul.f32 %v730_v20, %v718_v54 }
 0x296   :  { %v2219_v31 = vadd.f32 %v732_v30, %v727_v29 }
 0x298   :  { %v779_v32 = vpack.c.bf16 %v2219_v31, %v2219_v31 }
 0x29a   :  { %838 = vrot.lane.b32.xlu1 %v779_v32, %s1928_s5 }
 0x2a0   :  { %v833_v51 = vpop.f32.mrf.mxu0 }
 0x2a2   :  { %543 = vrot.lane.b32.xlu1 %v541_v25, %s1948_s17 }
 0x2a8   :  { %v835_v58 = vpop.f32.mrf.mxu0 }
 0x30c   :  { %v839_v38 = vpop.permute.xlu1 %838 }
 0x30d   :  { %1315 = vmatmul.msk.bf16.vlgmr.msra.gmra.mxu2 %vm374_vm1, %v839_v38 }
 0x314   :  { %v544_v54 = vpop.permute.xlu1 %543 }
 0x315   :  { %v546_v57 = vmul.f32 %v544_v54, %v2234_v52 }
 0x317   :  { %548 = vrot.lane.b32.xlu0 %v546_v57, %s1949_s22 }
 0x389   :  { %v549_v61 = vpop.permute.xlu0 %548 }
 0x38a   :  { %v551_v63 = vadd.f32 %v549_v61, %v2230_v33 }
 0x390   :  { %v876_v4 = vpop.f32.mrf.mxu2 }
 0x391   :  { %v877_v7 = vadd.f32 %v876_v4, %v833_v51 }
 0x393   :  { %v881_v8 = vadd.f32 %v880_v5, %v877_v7 }
 0x395   :  { %v882_v10 = vmax.f32 %v881_v8, 0.0 }
 0x397   :  { %v883_v11 = vpack.c.bf16 %v882_v10, %v882_v10 }
 0x398   :  { %v878_v13 = vpop.f32.mrf.mxu2 }
 0x399   :  { %1332 = vmatmul.msk.bf16.vlgmr.msra.gmra.mxu3 %vm374_vm1, %v883_v11  ;;  %v1104_v11 = vsel %vm403_vm0, %v2230_v33, %v2234_v52 }
 0x3a9   :  { %1352 = vmatmul.msk.bf16.vlgmr.msrb.gmra.mxu3 %vm374_vm1, %v839_v38 }
 0x41c   :  { %v929_v39 = vpop.f32.mrf.mxu3 }
 0x41d   :  { %v930_v14 = vadd.f32 %v929_v39, %v892_v36 }
 0x41f   :  { %v933_v15 = vmax.f32 %v930_v14, 0.0 }
 0x421   :  { %v934_v16 = vpack.c.bf16 %v933_v15, %v933_v15 }
 0x423   :  { %1349 = vmatmul.msk.bf16.vlgmr.msrb.gmra.mxu1 %vm374_vm1, %v934_v16  ;;  %1350 = vmatmul.msk.bf16.vlgmr.msrb.gmra.mxu0 %vm374_vm1, %v934_v16 }
 0x424   :  { %1351 = vmatmul.msk.bf16.vlgmr.msrb.gmra.mxu2 %vm374_vm1, %v934_v16  ;;  %v931_v3 = vpop.f32.mrf.mxu3 }
 0x42c   :  { %v1047_v6 = vpop.f32.mrf.mxu3 }
 0x42d   :  { %v1048_v19 = vadd.f32 %v1047_v6, %v641_v27 }
 0x433   :  { %1353 = vmatmul.msk.bf16.vlgmr.msra.gmra.mxu1 %vm374_vm1, %v839_v38 }
 0x434   :  { %v1049_v9 = vpop.f32.mrf.mxu3 }
 0x4a0   :  { %v980_v18 = vpop.f32.mrf.mxu1  ;;  %v1021_v55 = vpop.f32.mrf.mxu0 }
 0x4a1   :  { %v981_v20 = vadd.f32 %v980_v18, %v943_v12  ;;  %v1022_v21 = vadd.f32 %v1021_v55, %v561_v28 }
 0x4a3   :  { %v984_v29 = vadd.f32 0.54, %v981_v20  ;;  %v1064_v30 = vadd.f32 %v1048_v19, %v1022_v21  ;;  %1089 = vrot.lane.b32.xlu0 %v981_v20, %s1948_s17 }
 0x4a5   :  { %v986_v32 = vand.u32 2147483647, %v984_v29  ;;  %v1065_v25 = vmul.f32 0.5, %v1064_v30  ;;  %v985_v58 = vmax.f32 %v984_v29, 0.0 }
 0x4a7   :  { %v987_v26 = vsub.f32 0.0, %v986_v32  ;;  %1438 = vtanh.f32 %v1065_v25  ;;  %v1034_v35 = vpop.f32.mrf.mxu2 }
 0x4a8   :  { %v982_v34 = vpop.f32.mrf.mxu1  ;;  %v1023_v53 = vpop.f32.mrf.mxu0  ;;  %v1035_v43 = vadd.f32 %v1034_v35, %v562_v50 }
 0x4a9   :  { %v988_v37 = vmul.f32 1.442695, %v987_v26 }
 0x4ab   :  { %1440 = vpow2.f32 %v988_v37 }
 0x4ad   :  { %v1439_v56 = vpop.eup %1438 }
 0x4ae   :  { %v1067_v40 = vadd.f32 1.0, %v1439_v56 }
 0x4af   :  { %v1036_v27 = vpop.f32.mrf.mxu2 }
 0x4b0   :  { %v1068_v62 = vmul.f32 0.5, %v1067_v40  ;;  %v1060_v0 = vpop.f32.mrf.mxu1 }
 0x4b1   :  { %v1441_v41 = vpop.eup %1440  ;;  %v1061_v28 = vadd.f32 %v1060_v0, %v642_v49 }
 0x4b2   :  { %v990_v42 = vadd.f32 1.0, %v1441_v41  ;;  %v993_v45 = vmul.f32 -0.5, %v1441_v41  ;;  %v996_v48 = vand.u32 2147483647, %v1441_v41  ;;  %v1072_v1 = vsub.f32 1.0, %v1068_v62 }
 0x4b3   :  { %v1069_v44 = vmul.f32 %v1068_v62, %v1061_v28  ;;  %v1078_v5 = vmul.f32 %v1068_v62, %v2219_v31 }
 0x4b4   :  { %1442 = vlog2.f32 %v990_v42  ;;  %v994_v46 = vadd.f32 1.0, %v993_v45  ;;  %vm997_vm4 = vcmp.lt.f32.partialorder %v996_v48, 0.0004427343 }
 0x4b5   :  { %v1070_v38 = vadd.f32 %v1069_v44, %v1035_v43 }
 0x4b6   :  { %v995_v57 = vmul.f32 %v1441_v41, %v994_v46 }
 0x4b7   :  { %1444 = vtanh.f32 %v1070_v38 }
 0x4b8   :  { %v1062_v47 = vpop.f32.mrf.mxu1 }
 0x4ba   :  { %v1443_v51 = vpop.eup %1442 }
 0x4bb   :  { %v992_v54 = vmul.f32 0.6931472, %v1443_v51 }
 0x4bd   :  { %v1445_v59 = vpop.eup %1444  ;;  %v998_v22 = vsel %vm997_vm4, %v995_v57, %v992_v54 }
 0x4be   :  { %1074 = vrot.lane.b32.xlu2 %v1445_v59, %s1928_s5  ;;  %v999_v49 = vadd.f32 %v998_v22, %v985_v58 }
 0x4c0   :  { %v1000_v50 = vadd.f32 0.1, %v999_v49 }
 0x4c2   :  { %v1006_v60 = vmul.f32 %v1004_v23, %v1000_v50 }
 0x4c4   :  { %1008 = vrot.lane.b32.xlu1 %v1006_v60, %s1949_s22 }
 0x4c6   :  { %1085 = vrot.lane.b32.xlu2 %v2219_v31, %s1948_s17 }
 0x4cc   :  { %1081 = vrot.lane.b32.xlu1 %v551_v63, %s1928_s5 }
 0x4ce   :  { %1093 = vrot.lane.b32.xlu2 %v1000_v50, %s1948_s17 }
 0x515   :  { %v1090_v14 = vpop.permute.xlu0 %1089 }
 0x518   :  { %v1075_v2 = vpop.permute.xlu2 %1074 }
 0x519   :  { %v1077_v4 = vmul.f32 %v1075_v2, %v1072_v1 }
 0x51b   :  { %v1079_v7 = vadd.f32 %v1078_v5, %v1077_v4 }
 0x51d   :  { %1101 = vrot.lane.b32.xlu1 %v1079_v7, %s1928_s5  ;;  %s1950_s5 = smov [#allocation31]  }
 0x51e   :  { %s1120_s1 = sshll.u32 %s1950_s5, 4  ;;  %s1121_s1 = int_to_ptr.vmem [resolvable:$true] %s1120_s1 }
 0x520   :  { %v1086_v17 = vpop.permute.xlu2 %1085 }
 0x521   :  { %v1108_v33 = vsel %vm403_vm0, %v1086_v17, %v1090_v14 }
 0x528   :  { %v1094_v15 = vpop.permute.xlu2 %1093 }
 0x529   :  { %v1109_v52 = vsel %vm374_vm1, %v1108_v33, %v1094_v15 }
 0x536   :  { %v1009_v8 = vpop.permute.xlu1 %1008 }
 0x537   :  { %v1011_v10 = vadd.f32 %v1009_v8, %v981_v20 }
 0x539   :  { %1097 = vrot.lane.b32.xlu0 %v1011_v10, %s1949_s22 }
 0x53e   :  { %v1082_v13 = vpop.permute.xlu1 %1081 }
 0x53f   :  { %v1105_v24 = vsel %vm374_vm1, %v1104_v11, %v1082_v13 }
 0x540   :  { %v1107_v36 = vsel %vm1106_vm5, %v1105_v24, %v1086_v17 }
 0x541   :  { %1112 = vst [vmem:[#allocation31] sm:$0xff] %v1107_v36 }
 0x58f   :  { %v1102_v31 = vpop.permute.xlu1 %1101 }
 0x590   :  { %v1111_v39 = vsel %vm374_vm1, %v1102_v31, 0.0 }
 0x591   :  { %1114 = vst [vmem:[#allocation31 + $0x10] sm:$0xff] %v1111_v39 }
 0x5ab   :  { %v1098_v16 = vpop.permute.xlu0 %1097 }
 0x5ac   :  { %v1110_v3 = vsel %vm1106_vm5, %v1109_v52, %v1098_v16 }
 0x5ad   :  { %1113 = vst [vmem:[#allocation31 + $0x8] sm:$0xff] %v1110_v3 }
 0x5ae   :  { %1125 = dma.vmem_to_hbm [thread:$0]  %s1121_s1, 384, %s1123_s28, [#allocation4]  }
 0x5af   :  { %1922 = dma.done.wait [#allocation4], 384  }
 0x5b0   :  { %1923 = vsyncadd [#allocation4], 4294966912 }
 0x5b1   :  { %1130 = vsyncpa [#allocation3], 1 }
 0x5b2   :  { %1131 = vsyncpa [#allocation6], 1 }
 0x5b3   :  { %1132 = vsyncpa [#allocation9], 1 }
 0x5b4   :  { %1133 = vsyncpa [#allocation12], 1 }
 0x5b5   :  { %1134 = vsyncpa [#allocation15], 1 }
 0x5b6   :  { %1135 = vsyncpa [#allocation18], 1 }
 0x5b7   :  { %1136 = vsyncpa [#allocation21], 1 }
 0x5b8   :  { %1137 = vsyncpa [#allocation24], 1 }
 0x5b9   :  { %1138 = vsyncpa [#allocation27], 1 }
 0x5ba   :  { %1139 = vsyncpa [#allocation30], 1 }
 0x5bb   :  { %1140 = vsyncpa [#allocation4], 1 }

</bundles_post_ra>
